<compile_context>
chip_gen: v6e
topology: v6e:2x2x1
jax: 0.10.0
libtpu: 0.0.40
codegen_flags: <defaults>
</compile_context>

<pallas_src>
import functools
import math

import jax
import jax.numpy as jnp
from jax.experimental import pallas as pl
from jax.experimental.pallas import tpu as pltpu


# ----------------------------------------------------------------------------
# Tiling / compiler configuration
# ----------------------------------------------------------------------------

# ~4 MiB input blocks: measured >=2 MiB blocks hit ~85% of the HBM roofline and
# amortize the ~0.35 us per-grid-step overhead.
_TARGET_BLOCK_BYTES = 4 * 1024 * 1024


def _vmem_config():
    """Per-generation VMEM limit + pipeline budget from the hardware query."""
    cap = 64 * 1024 * 1024                      # conservative default (v7x per-TC)
    try:
        cap = int(pltpu.get_tpu_info().vmem_capacity_bytes)
    except Exception:
        pass
    # Leave headroom for compiler temporaries / spill; ~54 MiB on v7x (64 MiB),
    # ~108 MiB on v5e/v6e (128 MiB).
    limit = max(32 * 1024 * 1024, min(int(cap * 0.85), cap - 8 * 1024 * 1024))
    # Half the limit goes to the double-buffered pipeline (+ in-kernel f32
    # temporaries); ~27 MiB on v7x, ~54 MiB on v5e/v6e.
    budget = limit // 2
    return budget, limit


_VMEM_PIPELINE_BUDGET, _VMEM_LIMIT_BYTES = _vmem_config()

# "parallel" lets the row axis shard across the 2 TensorCores on v7x and is a
# no-op on single-TC v5e/v6e.
# TODO(synk): switch to pltpu.CORE_PARALLEL on v7x once cross-core sharding of
# this grid is verified in an xprof trace.
_COMPILER_PARAMS = pltpu.CompilerParams(
    dimension_semantics=("parallel",),
    vmem_limit_bytes=_VMEM_LIMIT_BYTES,
)


def _sublane_packing(dtype) -> int:
    # f32 -> 8, bf16 -> 16, int8/fp8 -> 32 rows per packed sublane tile.
    return max(8, 32 // jnp.dtype(dtype).itemsize)


def _choose_tile_rows(rows: int, dim_padded: int, dtype,
                      n_streams: int, n_outputs: int | None = None) -> int:
    """Row-tile size targeting ~2-8 MiB blocks within the VMEM budget."""
    if n_outputs is None:
        n_outputs = n_streams
    itemsize = jnp.dtype(dtype).itemsize
    packing = _sublane_packing(dtype)
    # Pipeline bytes per row: double-buffered input(s) + output(s) plus the
    # in-kernel f32 upcast temporaries (x_f32 / centered / result).
    per_row = (n_streams * 2 * dim_padded * itemsize
               + n_outputs * 2 * dim_padded * itemsize
               + n_streams * 3 * dim_padded * 4)
    budget_rows = max(1, _VMEM_PIPELINE_BUDGET // max(per_row, 1))
    target_rows = max(1, _TARGET_BLOCK_BYTES // (dim_padded * itemsize))
    tile = min(budget_rows, target_rows)
    tile = max(packing, (tile // packing) * packing)    # sublane-packed rows
    if rows <= tile:
        return rows          # full extent is always a legal block shape
    return tile


# ----------------------------------------------------------------------------
# Kernels
# ----------------------------------------------------------------------------

def _layernorm_block(x, g, b, eps, true_dim):
    """LayerNorm of one VMEM block; returns float32.

    `true_dim` is the unpadded feature size: if the lane axis was zero-padded
    to a multiple of 128, mean/var use a lane mask and divide by true_dim.
    """
    x = x.astype(jnp.float32)
    dpad = x.shape[-1]
    if true_dim == dpad:
        mean = jnp.mean(x, axis=-1, keepdims=True)
        xc = x - mean
        var = jnp.mean(xc * xc, axis=-1, keepdims=True)   # biased var, like torch
    else:
        inv_d = 1.0 / float(true_dim)
        mean = jnp.sum(x, axis=-1, keepdims=True) * inv_d  # padded lanes are zero
        xc = x - mean
        lane = jax.lax.broadcasted_iota(jnp.int32, (1, dpad), 1)
        mask = lane < true_dim
        var = jnp.sum(jnp.where(mask, xc * xc, 0.0), axis=-1, keepdims=True) * inv_d
    inv = jax.lax.rsqrt(var + eps)
    return xc * inv * g + b                                # g/b already float32


def _layernorm_kernel(x_ref, g_ref, b_ref, o_ref, *, eps, true_dim):
    o_ref[...] = _layernorm_block(x_ref[...], g_ref[...], b_ref[...],
                                  eps, true_dim).astype(o_ref.dtype)


def _dual_layernorm_kernel(x_ref, y_ref, gx_ref, bx_ref, gy_ref, by_ref,
                           ox_ref, oy_ref, *, eps, true_dim):
    ox_ref[...] = _layernorm_block(x_ref[...], gx_ref[...], bx_ref[...],
                                   eps, true_dim).astype(ox_ref.dtype)
    oy_ref[...] = _layernorm_block(y_ref[...], gy_ref[...], by_ref[...],
                                   eps, true_dim).astype(oy_ref.dtype)


def _dual_layernorm_add_kernel(x_ref, y_ref, gx_ref, bx_ref, gy_ref, by_ref,
                               o_ref, *, eps, true_dim):
    nx = _layernorm_block(x_ref[...], gx_ref[...], bx_ref[...], eps, true_dim)
    ny = _layernorm_block(y_ref[...], gy_ref[...], by_ref[...], eps, true_dim)
    o_ref[...] = (nx + ny).astype(o_ref.dtype)


# ----------------------------------------------------------------------------
# Wrappers
# ----------------------------------------------------------------------------

def _flatten_pad(x):
    """(..., dim) -> (rows, dim_padded): flatten rows, lane-pad dim to 128*k."""
    dim = x.shape[-1]
    rows = int(math.prod(x.shape[:-1])) if x.ndim > 1 else 1
    x2 = x.reshape(rows, dim)
    dim_pad = ((dim + 127) // 128) * 128
    if dim_pad != dim:
        x2 = jnp.pad(x2, ((0, 0), (0, dim_pad - dim)))
    return x2, rows, dim, dim_pad


def _prep_param(p, dim, dim_pad):
    p = p.reshape(1, dim).astype(jnp.float32)     # f32 params, like torch
    if dim_pad != dim:
        p = jnp.pad(p, ((0, 0), (0, dim_pad - dim)))
    return p


def layernorm_pallas(x, gamma, beta, *, eps=1e-5, tile_rows=None):
    """LayerNorm over the last axis of x, computed in a Pallas TPU kernel."""
    orig_shape = x.shape
    x2, rows, dim, dim_pad = _flatten_pad(x)
    g2 = _prep_param(gamma, dim, dim_pad)
    b2 = _prep_param(beta, dim, dim_pad)

    if tile_rows is None:
        tile_rows = _choose_tile_rows(rows, dim_pad, x.dtype, n_streams=1)
    tile_rows = min(tile_rows, rows)

    grid = (pl.cdiv(rows, tile_rows),)            # ragged last block OK
    row_spec = pl.BlockSpec((tile_rows, dim_pad), lambda i: (i, 0))
    par_spec = pl.BlockSpec((1, dim_pad), lambda i: (0, 0))
    itemsize = jnp.dtype(x.dtype).itemsize
    cost = pl.CostEstimate(flops=8 * rows * dim_pad,
                           transcendentals=rows,
                           bytes_accessed=2 * rows * dim_pad * itemsize
                                          + 2 * dim_pad * 4)

    out = pl.pallas_call(
        functools.partial(_layernorm_kernel, eps=eps, true_dim=dim),
        out_shape=jax.ShapeDtypeStruct((rows, dim_pad), x.dtype),
        grid_spec=pltpu.PrefetchScalarGridSpec(
            num_scalar_prefetch=0,
            grid=grid,
            in_specs=[row_spec, par_spec, par_spec],
            out_specs=row_spec,
        ),
        compiler_params=_COMPILER_PARAMS,
        cost_estimate=cost,
    )(x2, g2, b2)
    if dim_pad != dim:
        out = out[:, :dim]
    return out.reshape(orig_shape)


def dual_layernorm_pallas(x, y, gx, bx, gy, by, *, eps=1e-5, tile_rows=None):
    """Two independent LayerNorms (x with gx/bx, y with gy/by) in ONE launch."""
    assert x.shape == y.shape and x.dtype == y.dtype
    orig_shape = x.shape
    x2, rows, dim, dim_pad = _flatten_pad(x)
    y2, _, _, _ = _flatten_pad(y)
    gx2 = _prep_param(gx, dim, dim_pad)
    bx2 = _prep_param(bx, dim, dim_pad)
    gy2 = _prep_param(gy, dim, dim_pad)
    by2 = _prep_param(by, dim, dim_pad)

    if tile_rows is None:
        tile_rows = _choose_tile_rows(rows, dim_pad, x.dtype,
                                      n_streams=2, n_outputs=2)
    tile_rows = min(tile_rows, rows)

    grid = (pl.cdiv(rows, tile_rows),)
    row_spec = pl.BlockSpec((tile_rows, dim_pad), lambda i: (i, 0))
    par_spec = pl.BlockSpec((1, dim_pad), lambda i: (0, 0))
    itemsize = jnp.dtype(x.dtype).itemsize
    cost = pl.CostEstimate(flops=16 * rows * dim_pad,
                           transcendentals=2 * rows,
                           bytes_accessed=4 * rows * dim_pad * itemsize
                                          + 4 * dim_pad * 4)

    nx, ny = pl.pallas_call(
        functools.partial(_dual_layernorm_kernel, eps=eps, true_dim=dim),
        out_shape=(jax.ShapeDtypeStruct((rows, dim_pad), x.dtype),
                   jax.ShapeDtypeStruct((rows, dim_pad), y.dtype)),
        grid_spec=pltpu.PrefetchScalarGridSpec(
            num_scalar_prefetch=0,
            grid=grid,
            in_specs=[row_spec, row_spec, par_spec, par_spec, par_spec, par_spec],
            out_specs=[row_spec, row_spec],
        ),
        compiler_params=_COMPILER_PARAMS,
        cost_estimate=cost,
    )(x2, y2, gx2, bx2, gy2, by2)
    if dim_pad != dim:
        nx, ny = nx[:, :dim], ny[:, :dim]
    return nx.reshape(orig_shape), ny.reshape(orig_shape)


def dual_layernorm_add_pallas(x, y, gx, bx, gy, by, *, eps=1e-5, tile_rows=None):
    """Fused norm1(x) + norm2(y): one launch, one output (3 HBM passes)."""
    assert x.shape == y.shape and x.dtype == y.dtype
    orig_shape = x.shape
    x2, rows, dim, dim_pad = _flatten_pad(x)
    y2, _, _, _ = _flatten_pad(y)
    gx2 = _prep_param(gx, dim, dim_pad)
    bx2 = _prep_param(bx, dim, dim_pad)
    gy2 = _prep_param(gy, dim, dim_pad)
    by2 = _prep_param(by, dim, dim_pad)

    if tile_rows is None:
        tile_rows = _choose_tile_rows(rows, dim_pad, x.dtype,
                                      n_streams=2, n_outputs=1)
    tile_rows = min(tile_rows, rows)

    grid = (pl.cdiv(rows, tile_rows),)
    row_spec = pl.BlockSpec((tile_rows, dim_pad), lambda i: (i, 0))
    par_spec = pl.BlockSpec((1, dim_pad), lambda i: (0, 0))
    itemsize = jnp.dtype(x.dtype).itemsize
    cost = pl.CostEstimate(flops=17 * rows * dim_pad,
                           transcendentals=2 * rows,
                           bytes_accessed=3 * rows * dim_pad * itemsize
                                          + 4 * dim_pad * 4)

    out = pl.pallas_call(
        functools.partial(_dual_layernorm_add_kernel, eps=eps, true_dim=dim),
        out_shape=jax.ShapeDtypeStruct((rows, dim_pad), x.dtype),
        grid_spec=pltpu.PrefetchScalarGridSpec(
            num_scalar_prefetch=0,
            grid=grid,
            in_specs=[row_spec, row_spec, par_spec, par_spec, par_spec, par_spec],
            out_specs=row_spec,
        ),
        compiler_params=_COMPILER_PARAMS,
        cost_estimate=cost,
    )(x2, y2, gx2, bx2, gy2, by2)
    if dim_pad != dim:
        out = out[:, :dim]
    return out.reshape(orig_shape)


# ----------------------------------------------------------------------------
# Module mirror
# ----------------------------------------------------------------------------

class PreNormPallas:
    """Mirror of the PyTorch PreNorm module; LayerNorm runs in Pallas.

    If `fuse_dual_add=True` the caller guarantees the wrapped `fn(a, b)` is an
    elementwise add of the two normalized streams; that case is fused into a
    single Pallas kernel (3 HBM passes instead of 7).
    """

    def __init__(self, dim, fn, dual=False, key=None, fuse_dual_add=False):
        self.dual = dual
        self.fn = fn
        self.fuse_dual_add = fuse_dual_add and dual
        if key is None:
            key = jax.random.PRNGKey(0)
        k1, k2, k3, k4 = jax.random.split(key, 4)
        # nn.LayerNorm default init is weight=1, bias=0; small deterministic
        # perturbations so the affine path is exercised.  Params kept in f32.
        self.g1 = 1.0 + 0.1 * jax.random.normal(k1, (dim,), jnp.float32)
        self.b1 = 0.1 * jax.random.normal(k2, (dim,), jnp.float32)
        if dual:
            self.g2 = 1.0 + 0.1 * jax.random.normal(k3, (dim,), jnp.float32)
            self.b2 = 0.1 * jax.random.normal(k4, (dim,), jnp.float32)
        else:
            self.g2 = None
            self.b2 = None

    def __call__(self, x, *args, **kwargs):
        if self.dual:
            y = args[0]
            same = (y.shape == x.shape and y.dtype == x.dtype)
            if self.fuse_dual_add and same and not args[1:] and not kwargs:
                # Fused: both LayerNorms + the elementwise add in ONE kernel.
                return dual_layernorm_add_pallas(x, y, self.g1, self.b1,
                                                 self.g2, self.b2)
            if same:
                nx, ny = dual_layernorm_pallas(x, y, self.g1, self.b1,
                                               self.g2, self.b2)
            else:
                nx = layernorm_pallas(x, self.g1, self.b1)
                ny = layernorm_pallas(y, self.g2, self.b2)
            # TODO(synk): arbitrary (non-add) `fn` stays in plain JAX.
            return self.fn(nx, ny, *args[1:], **kwargs)
        nx = layernorm_pallas(x, self.g1, self.b1)
        return self.fn(nx, *args, **kwargs)


# ----------------------------------------------------------------------------
# Reference + test
# ----------------------------------------------------------------------------

def _layernorm_ref(x, gamma, beta, eps=1e-5):
    x32 = x.astype(jnp.float32)
    mean = jnp.mean(x32, axis=-1, keepdims=True)
    var = jnp.mean((x32 - mean) ** 2, axis=-1, keepdims=True)
    return ((x32 - mean) * jax.lax.rsqrt(var + eps) * gamma + beta).astype(x.dtype)


if __name__ == "__main__":
    B, N, D = 2, 8, 128      # lane-dense feature dim (multiple of 128)
    key = jax.random.PRNGKey(0)
    kx, ky, kw, kp = jax.random.split(key, 4)
    x = jax.random.normal(kx, (B, N, D), jnp.float32)
    y = jax.random.normal(ky, (B, N, D), jnp.float32)

    # --- single (dual=False): fn is a simple projection (plain-JAX glue) ---
    W = 0.05 * jax.random.normal(kw, (D, D), jnp.float32)
    fn_single = lambda a: jnp.einsum("bnd,de->bne", a, W)
    pre_single = PreNormPallas(D, fn_single, dual=False, key=kp)
    out_single = jax.block_until_ready(pre_single(x))
    ref_single = fn_single(_layernorm_ref(x, pre_single.g1, pre_single.b1))

    # --- dual (dual=True): two LayerNorms in one launch, fn in plain JAX ---
    fn_dual = lambda a, b: a + b
    pre_dual = PreNormPallas(D, fn_dual, dual=True, key=kp)
    out_dual = jax.block_until_ready(pre_dual(x, y))
    ref_dual = fn_dual(
        _layernorm_ref(x, pre_dual.g1, pre_dual.b1),
        _layernorm_ref(y, pre_dual.g2, pre_dual.b2),
    )

    # --- dual + fused elementwise-add fn: single kernel, single output ---
    pre_dual_fused = PreNormPallas(D, fn_dual, dual=True, key=kp,
                                   fuse_dual_add=True)
    out_dual_fused = jax.block_until_ready(pre_dual_fused(x, y))

    # --- ragged grid path (no host-side row padding) ---
    x3 = jax.random.normal(ky, (2, 11, D), jnp.float32)      # 22 rows, tile 8
    out_ragged = jax.block_until_ready(
        layernorm_pallas(x3, pre_single.g1, pre_single.b1, tile_rows=8))
    ref_ragged = _layernorm_ref(x3, pre_single.g1, pre_single.b1)

    # --- bf16 input: affine params stay f32 inside the kernel ---
    x_bf = x.astype(jnp.bfloat16)
    out_bf = jax.block_until_ready(
        layernorm_pallas(x_bf, pre_single.g1, pre_single.b1))
    ref_bf = _layernorm_ref(x_bf, pre_single.g1, pre_single.b1)

    # --- non-multiple-of-128 feature dim: lane pad + masked mean/var ---
    D2 = 96
    kg, kb, kx2 = jax.random.split(kp, 3)
    g96 = 1.0 + 0.1 * jax.random.normal(kg, (D2,), jnp.float32)
    b96 = 0.1 * jax.random.normal(kb, (D2,), jnp.float32)
    x96 = jax.random.normal(kx2, (2, 8, D2), jnp.float32)
    out_96 = jax.block_until_ready(layernorm_pallas(x96, g96, b96))
    ref_96 = _layernorm_ref(x96, g96, b96)

    assert out_single.shape == (B, N, D) and out_dual.shape == (B, N, D)
    assert jnp.allclose(out_single, ref_single, atol=1e-5, rtol=1e-5)
    assert jnp.allclose(out_dual, ref_dual, atol=1e-5, rtol=1e-5)
    assert jnp.allclose(out_dual_fused, ref_dual, atol=1e-5, rtol=1e-5)
    assert jnp.allclose(out_ragged, ref_ragged, atol=1e-5, rtol=1e-5)
    assert jnp.allclose(out_bf.astype(jnp.float32), ref_bf.astype(jnp.float32),
                        atol=2e-2, rtol=2e-2)
    assert jnp.allclose(out_96, ref_96, atol=1e-5, rtol=1e-5)
    print("KERNEL_OK")
</pallas_src>

<mosaic_0001>
module attributes {stable_mosaic.version = 11 : i64} {
  func.func @_layernorm_kernel(%arg0: i32, %arg1: memref<16x128xf32, #tpu.memory_space<vmem>>, %arg2: memref<1x128xf32, #tpu.memory_space<vmem>>, %arg3: memref<1x128xf32, #tpu.memory_space<vmem>>, %arg4: memref<16x128xf32, #tpu.memory_space<vmem>>) attributes {dimension_semantics = [#tpu.dimension_semantics<parallel>], iteration_bounds = array<i64: 1>, scalar_prefetch = 0 : i64, scratch_operands = 0 : i64, tpu.core_type = #tpu.core_type<tc>, window_params = [{transform_indices = @transform_0, window_bounds = array<i64: 16, 128>}, {pipeline_mode = #tpu.pipeline_mode<synchronous>, transform_indices = @transform_1, window_bounds = array<i64: 1, 128>}, {pipeline_mode = #tpu.pipeline_mode<synchronous>, transform_indices = @transform_2, window_bounds = array<i64: 1, 128>}, {transform_indices = @transform_3, window_bounds = array<i64: 16, 128>}]} {
    %c0 = arith.constant 0 : index
    %c0_0 = arith.constant 0 : index
    %0 = vector.load %arg1[%c0, %c0_0] : memref<16x128xf32, #tpu.memory_space<vmem>>, vector<16x128xf32>
    %c0_1 = arith.constant 0 : index
    %c0_2 = arith.constant 0 : index
    %1 = vector.load %arg2[%c0_1, %c0_2] : memref<1x128xf32, #tpu.memory_space<vmem>>, vector<1x128xf32>
    %c0_3 = arith.constant 0 : index
    %c0_4 = arith.constant 0 : index
    %2 = vector.load %arg3[%c0_3, %c0_4] : memref<1x128xf32, #tpu.memory_space<vmem>>, vector<1x128xf32>
    %cst = arith.constant dense<0.000000e+00> : vector<16xf32>
    %3 = vector.multi_reduction <add>, %0, %cst [1] : vector<16x128xf32> to vector<16xf32>
    %4 = vector.shape_cast %3 : vector<16xf32> to vector<16x1xf32>
    %cst_5 = arith.constant 1.280000e+02 : f32
    %5 = vector.broadcast %cst_5 : f32 to vector<16x1xf32>
    %6 = arith.divf %4, %5 : vector<16x1xf32>
    %7 = vector.broadcast %6 : vector<16x1xf32> to vector<16x128xf32>
    %8 = arith.subf %0, %7 : vector<16x128xf32>
    %9 = arith.mulf %8, %8 : vector<16x128xf32>
    %cst_6 = arith.constant dense<0.000000e+00> : vector<16xf32>
    %10 = vector.multi_reduction <add>, %9, %cst_6 [1] : vector<16x128xf32> to vector<16xf32>
    %11 = vector.shape_cast %10 : vector<16xf32> to vector<16x1xf32>
    %cst_7 = arith.constant 1.280000e+02 : f32
    %12 = vector.broadcast %cst_7 : f32 to vector<16x1xf32>
    %13 = arith.divf %11, %12 : vector<16x1xf32>
    %cst_8 = arith.constant 9.99999974E-6 : f32
    %14 = vector.broadcast %cst_8 : f32 to vector<16x1xf32>
    %15 = arith.addf %13, %14 : vector<16x1xf32>
    %16 = math.rsqrt %15 : vector<16x1xf32>
    %17 = vector.broadcast %16 : vector<16x1xf32> to vector<16x128xf32>
    %18 = arith.mulf %8, %17 : vector<16x128xf32>
    %19 = vector.broadcast %1 : vector<1x128xf32> to vector<16x128xf32>
    %20 = arith.mulf %18, %19 : vector<16x128xf32>
    %21 = vector.broadcast %2 : vector<1x128xf32> to vector<16x128xf32>
    %22 = arith.addf %20, %21 : vector<16x128xf32>
    %c0_9 = arith.constant 0 : index
    %c0_10 = arith.constant 0 : index
    %23 = vector.load %arg4[%c0_9, %c0_10] : memref<16x128xf32, #tpu.memory_space<vmem>>, vector<16x128xf32>
    tpu.vector_store %arg4[%c0_9, %c0_10], %22 {strides = array<i32>} : memref<16x128xf32, #tpu.memory_space<vmem>>, vector<16x128xf32>,
    return
  }
  func.func @transform_0(%arg0: i32) -> (i32, i32) {
    %c0_i32 = arith.constant 0 : i32
    %c0_i32_0 = arith.constant 0 : i32
    return %arg0, %c0_i32 : i32, i32
  }
  func.func @transform_1(%arg0: i32) -> (i32, i32) {
    %c0_i32 = arith.constant 0 : i32
    %c0_i32_0 = arith.constant 0 : i32
    %c0_i32_1 = arith.constant 0 : i32
    return %c0_i32, %c0_i32_0 : i32, i32
  }
  func.func @transform_2(%arg0: i32) -> (i32, i32) {
    %c0_i32 = arith.constant 0 : i32
    %c0_i32_0 = arith.constant 0 : i32
    %c0_i32_1 = arith.constant 0 : i32
    return %c0_i32, %c0_i32_0 : i32, i32
  }
  func.func @transform_3(%arg0: i32) -> (i32, i32) {
    %c0_i32 = arith.constant 0 : i32
    %c0_i32_0 = arith.constant 0 : i32
    return %arg0, %c0_i32 : i32, i32
  }
}

</mosaic_0001>

<bundles_post_ra>
// kernel: tpu_custom_call.1
= control target key start
LH: loop header
LB: loop body
LE: loop exit
PB: predicated region body
PF: predicated region fallthrough
CT: control target
= control target key end

     0   :  { %8 = vsyncpa [#allocation3], 0  ;;  %s187_s0 = inlined_call_operand.hbm [shape: f32[16,128], index: 0, kind: input, shape index: {}]   ;;  %s188_s1 = inlined_call_operand.vmem [shape: f32[1,128], index: 1, kind: input, shape index: {}]   ;;  %s189_s2 = inlined_call_operand.vmem [shape: f32[1,128], index: 2, kind: input, shape index: {}]   ;;  %s190_s3 = inlined_call_operand.hbm [shape: f32[16,128], index: 3, kind: output, shape index: {}]  }
   0x1   :  { %9 = vsyncpa [#allocation4], 0  ;;  %s145_s12 = smov [#allocation2]  }
   0x2   :  { %s15_s13 = sshll.u32 %s145_s12, 4  ;;  %s16_s13 = int_to_ptr.vmem [resolvable:$true] %s15_s13 }
   0x3   :  { %s109_s14 = scalar_lea.vmem %s16_s13, 256  ;;  %p114_p1 = scmp.lt.s32.totalorder %s16_s13, %s16_s13 }
   0x4   :  { %p110_p0 = scmp.ne.s32.totalorder %s16_s13, %s109_s14  ;;  %p115_p2 = scmp.lt.s32.totalorder %s109_s14, %s109_s14 }
   0x6   :  { %p116_p3 = por %p115_p2, %p114_p1 }
   0x8   :  { %p117_p4 = pnand %p116_p3, %p110_p0 }
   0xa   :  { %120 = shalt.err (!%p117_p4)
}
   0xb   :  { %s146_s15 = smov 128   ;;  %s147_s16 = smov 8  }
   0xc   :  { %21 = dma.hbm_to_vmem [thread:$0]  %s187_s0, 256, %s16_s13, [#allocation3], %s146_s15, %s146_s15, %s147_s16  }
   0xd   :  { %141 = dma.done.wait [#allocation3], 256  }
   0xe   :  { %142 = vsyncadd [#allocation3], 4294967040  ;;  %v29_v0 = vld [vmem:[#allocation2] sm:$0xff]  ;;  %v30_v1 = vld [vmem:[#allocation2 + $0x8] sm:$0xff]  ;;  %s148_s22 = smov [#allocation5]  }
   0xf   :  { %33 = vadd.xlane.f32.xlu0 %v29_v0  ;;  %v91_v17 = vld [vmem:[%s188_s1] ss:$0 sm:$0xff]  ;;  %s79_s23 = sshll.u32 %s148_s22, 4  ;;  %s80_s23 = int_to_ptr.vmem [resolvable:$true] %s79_s23 }
  0x10   :  { %v92_v19 = vld [vmem:[%s189_s2] ss:$0 sm:$0xff]  ;;  %s121_s24 = scalar_lea.vmem %s80_s23, 256  ;;  %p126_p6 = scmp.lt.s32.totalorder %s80_s23, %s80_s23 }
  0x11   :  { %p122_p5 = scmp.ne.s32.totalorder %s80_s23, %s121_s24  ;;  %p127_p7 = scmp.lt.s32.totalorder %s121_s24, %s121_s24 }
  0x13   :  { %35 = vadd.xlane.f32.xlu0 %v30_v1  ;;  %p128_p8 = por %p127_p7, %p126_p6 }
  0x15   :  { %p129_p9 = pnand %p128_p8, %p122_p5 }
  0x98   :  { %v34_v2 = vpop.xlane.xlu0 %33 }
  0x99   :  { %v38_v3 = vmul.f32 0.0078125, %v34_v2 }
  0x9b   :  { %v40_v4 = vsub.f32 %v29_v0, %v38_v3 }
  0x9c   :  { %v36_v5 = vpop.xlane.xlu0 %35 }
  0x9d   :  { %v39_v6 = vmul.f32 0.0078125, %v36_v5  ;;  %v42_v7 = vmul.f32 %v40_v4, %v40_v4 }
  0x9f   :  { %v41_v8 = vsub.f32 %v30_v1, %v39_v6  ;;  %44 = vadd.xlane.f32.xlu1 %v42_v7 }
  0xa1   :  { %v43_v9 = vmul.f32 %v41_v8, %v41_v8 }
  0xa3   :  { %46 = vadd.xlane.f32.xlu1 %v43_v9 }
 0x128   :  { %v45_v10 = vpop.xlane.xlu1 %44 }
 0x129   :  { %v48_v11 = vmul.f32 0.0078125, %v45_v10 }
 0x12b   :  { %v50_v12 = vadd.f32 1e-05, %v48_v11 }
 0x12c   :  { %v47_v13 = vpop.xlane.xlu1 %46 }
 0x12d   :  { %97 = vrsqrt.f32 %v50_v12  ;;  %v49_v14 = vmul.f32 0.0078125, %v47_v13 }
 0x12f   :  { %v51_v15 = vadd.f32 1e-05, %v49_v14 }
 0x131   :  { %99 = vrsqrt.f32 %v51_v15 }
 0x13a   :  { %v98_v16 = vpop.eup %97 }
 0x13b   :  { %v54_v18 = vmul.f32 %v98_v16, %v40_v4 }
 0x13d   :  { %v62_v20 = vmul.f32 %v91_v17, %v54_v18 }
 0x13e   :  { %v100_v21 = vpop.eup %99 }
 0x13f   :  { %v55_v22 = vmul.f32 %v100_v21, %v41_v8  ;;  %v70_v23 = vadd.f32 %v92_v19, %v62_v20 }
 0x141   :  { %v63_v24 = vmul.f32 %v91_v17, %v55_v22  ;;  %72 = vst [vmem:[#allocation5] sm:$0xff] %v70_v23 }
 0x143   :  { %v71_v25 = vadd.f32 %v92_v19, %v63_v24 }
 0x145   :  { %73 = vst [vmem:[#allocation5 + $0x8] sm:$0xff] %v71_v25 }
 0x146   :  { %132 = shalt.err (!%p129_p9)
}
 0x147   :  { %85 = dma.vmem_to_hbm [thread:$0]  %s80_s23, 256, %s190_s3, [#allocation4], %s146_s15, %s146_s15, %s147_s16  }
 0x148   :  { %143 = dma.done.wait [#allocation4], 256  }
 0x149   :  { %144 = vsyncadd [#allocation4], 4294967040 }
 0x14a   :  { %89 = vsyncpa [#allocation3], 1 }
 0x14b   :  { %90 = vsyncpa [#allocation4], 1 }

</bundles_post_ra>
